<compile_context>
chip_gen: v6e
topology: v6e:2x2x1
jax: 0.10.0
libtpu: 0.0.40
codegen_flags: <defaults>
</compile_context>

<pallas_src>
import math
import jax
import jax.numpy as jnp
from jax.experimental import pallas as pl
from jax.experimental.pallas import tpu as pltpu

_GELU_C = math.sqrt(2.0 / math.pi)
_EPS = 1e-6


# ----------------------------- kernel helpers ------------------------------

def _layernorm_bf16(x_f32, gamma, beta):
    """f32 LayerNorm (eps=1e-6), result cast to bf16 for the MXU."""
    mean = jnp.mean(x_f32, axis=-1, keepdims=True)
    cent = x_f32 - mean
    var = jnp.mean(cent * cent, axis=-1, keepdims=True)
    xn = cent * jax.lax.rsqrt(var + _EPS)
    return (xn * gamma + beta).astype(jnp.bfloat16)


def _gelu_tanh(h):
    # 0.5*h*(1 + tanh(c*(h + 0.044715*h^3))); polynomial factored as
    # h*(1 + 0.044715*h*h) to drop one vmul; tanh goes to the EUP slot.
    return 0.5 * h * (1.0 + jnp.tanh(_GELU_C * h * (1.0 + 0.044715 * h * h)))


# ------------------------------- kernels -----------------------------------

def ffn_kernel_resident(x_ref, gamma_ref, beta_ref, w1_ref, b1_ref, w2_ref,
                        b2_ref, o_ref):
    """1-D grid over token tiles; full (bf16) W1/W2 are VMEM-resident."""
    xn = _layernorm_bf16(x_ref[...].astype(jnp.float32),
                         gamma_ref[...], beta_ref[...])
    h = jnp.dot(xn, w1_ref[...], preferred_element_type=jnp.float32) + b1_ref[...]
    h = _gelu_tanh(h)
    # (Dropout is identity in eval mode.)
    out = jnp.dot(h.astype(jnp.bfloat16), w2_ref[...],
                  preferred_element_type=jnp.float32) + b2_ref[...]
    o_ref[...] = out.astype(o_ref.dtype)


def ffn_kernel_tiled(x_ref, gamma_ref, beta_ref, w1_ref, b1_ref, w2_ref,
                     b2_ref, o_ref, xn_ref):
    """2-D grid (token tiles, hidden tiles); hidden (reduction) axis innermost.

    The f32 output block (constant block index across j -> VMEM-resident)
    doubles as the Linear-2 accumulator, so no separate acc scratch is needed.
    """
    j = pl.program_id(1)

    @pl.when(j == 0)
    def _():
        # LayerNorm once per token tile, stashed in bf16 for reuse across j;
        # initialise the accumulator/output with the Linear-2 bias.
        xn_ref[...] = _layernorm_bf16(x_ref[...].astype(jnp.float32),
                                      gamma_ref[...], beta_ref[...])
        o_ref[...] = jnp.broadcast_to(b2_ref[...], o_ref.shape)

    h = jnp.dot(xn_ref[...], w1_ref[...],
                preferred_element_type=jnp.float32) + b1_ref[...]
    h = _gelu_tanh(h)
    # (Dropout is identity in eval mode.)
    o_ref[...] += jnp.dot(h.astype(jnp.bfloat16), w2_ref[...],
                          preferred_element_type=jnp.float32)


# --------------------------- tiling / gen config ---------------------------

def _tpu_generation():
    try:
        kind = jax.devices()[0].device_kind.lower()
    except Exception:
        return "unknown"
    if "v7" in kind or "tpu7" in kind:
        return "v7x"
    if "v6" in kind or "tpu6" in kind:
        return "v6e"
    if "v5" in kind:
        return "v5e"
    return "unknown"


# vmem_limit: Mosaic scoped-VMEM cap; budget: what the tile picker plans for
# (headroom below the limit for compiler-internal scratch); tm_target: token
# tile needed to reach the MXU roofline when weights are streamed; th_cands:
# hidden-tile preferences (multiples of 256 feed the 2x256^2 MXUs on v6e/v7x,
# 256 first on v7x to halve the double-buffered weight footprint).
_GEN_CFG = {
    "v5e":     dict(vmem_limit=100 << 20, budget=80 << 20, tm_target=256,
                    th_cands=(512, 256, 128)),
    "v6e":     dict(vmem_limit=110 << 20, budget=90 << 20, tm_target=1024,
                    th_cands=(512, 256, 128)),
    "v7x":     dict(vmem_limit=52 << 20,  budget=42 << 20, tm_target=512,
                    th_cands=(256, 512, 128)),
    "unknown": dict(vmem_limit=48 << 20,  budget=38 << 20, tm_target=512,
                    th_cands=(512, 256, 128)),
}

_TM_CANDS = (1024, 768, 512, 384, 256, 192, 128, 96, 64, 32, 16, 8)


def _pick_tile(n, candidates):
    for t in candidates:
        if t <= n and n % t == 0:
            return t
    return n  # full extent is always a legal block shape


def _pick_tm(m, tm_target, tm_budget_max, want_two_tiles):
    cands = [t for t in _TM_CANDS if t <= tm_target and t <= tm_budget_max]
    if want_two_tiles:
        # v7x: keep >= 2 token tiles so the "parallel" axis shards over both TCs.
        for t in cands:
            if m % t == 0 and m // t >= 2:
                return t
    for t in cands:
        if m % t == 0:
            return t
    return m  # fall back to the full extent (always divides)


# ------------------------------ host wrappers -------------------------------

def prepare_ffn_params(gamma, beta, w1, b1, w2, b2):
    """One-time parameter prep: bf16 (in, out) weights, f32 (1, N) vectors.

    Do this once at init: the f32->bf16 weight conversion is a full HBM pass
    and must not be paid on every forward call.
    """
    d, hid = w1.shape
    return dict(
        gamma=jnp.asarray(gamma, jnp.float32).reshape(1, d),
        beta=jnp.asarray(beta, jnp.float32).reshape(1, d),
        w1=jnp.asarray(w1, jnp.bfloat16),
        b1=jnp.asarray(b1, jnp.float32).reshape(1, hid),
        w2=jnp.asarray(w2, jnp.bfloat16),
        b2=jnp.asarray(b2, jnp.float32).reshape(1, d),
    )


def _ffn_resident(x2d, params, tm, vmem_limit):
    m, d = x2d.shape
    hid = params["w1"].shape[1]
    return pl.pallas_call(
        ffn_kernel_resident,
        out_shape=jax.ShapeDtypeStruct((m, d), x2d.dtype),
        grid_spec=pltpu.PrefetchScalarGridSpec(
            num_scalar_prefetch=0,
            grid=(m // tm,),
            in_specs=[
                pl.BlockSpec((tm, d), lambda i: (i, 0)),    # x
                pl.BlockSpec((1, d), lambda i: (0, 0)),     # gamma
                pl.BlockSpec((1, d), lambda i: (0, 0)),     # beta
                pl.BlockSpec((d, hid), lambda i: (0, 0)),   # w1 (bf16, resident)
                pl.BlockSpec((1, hid), lambda i: (0, 0)),   # b1
                pl.BlockSpec((hid, d), lambda i: (0, 0)),   # w2 (bf16, resident)
                pl.BlockSpec((1, d), lambda i: (0, 0)),     # b2
            ],
            out_specs=pl.BlockSpec((tm, d), lambda i: (i, 0)),
        ),
        compiler_params=pltpu.CompilerParams(
            dimension_semantics=("parallel",),
            vmem_limit_bytes=vmem_limit,
        ),
    )(x2d, params["gamma"], params["beta"], params["w1"], params["b1"],
      params["w2"], params["b2"])


def _ffn_tiled(x2d, params, tm, th, vmem_limit):
    m, d = x2d.shape
    hid = params["w1"].shape[1]
    out = pl.pallas_call(
        ffn_kernel_tiled,
        # f32 output doubles as the reduction accumulator (resident across j).
        out_shape=jax.ShapeDtypeStruct((m, d), jnp.float32),
        grid_spec=pltpu.PrefetchScalarGridSpec(
            num_scalar_prefetch=0,
            grid=(m // tm, hid // th),                      # reduction axis last
            in_specs=[
                pl.BlockSpec((tm, d), lambda i, j: (i, 0)),   # x
                pl.BlockSpec((1, d), lambda i, j: (0, 0)),    # gamma
                pl.BlockSpec((1, d), lambda i, j: (0, 0)),    # beta
                pl.BlockSpec((d, th), lambda i, j: (0, j)),   # w1 (bf16)
                pl.BlockSpec((1, th), lambda i, j: (0, j)),   # b1
                pl.BlockSpec((th, d), lambda i, j: (j, 0)),   # w2 (bf16)
                pl.BlockSpec((1, d), lambda i, j: (0, 0)),    # b2
            ],
            out_specs=pl.BlockSpec((tm, d), lambda i, j: (i, 0)),
            scratch_shapes=[pltpu.VMEM((tm, d), jnp.bfloat16)],  # LN result
        ),
        compiler_params=pltpu.CompilerParams(
            dimension_semantics=("parallel", "arbitrary"),
            vmem_limit_bytes=vmem_limit,
        ),
    )(x2d, params["gamma"], params["beta"], params["w1"], params["b1"],
      params["w2"], params["b2"])
    return out.astype(x2d.dtype)   # no-op for f32 inputs


def feed_forward(x, params):
    """x: (batch, seq, d_model). Returns eval-mode FFN output, same shape/dtype."""
    batch, seq, d = x.shape
    m = batch * seq
    hid = params["w1"].shape[1]
    x2d = x.reshape(m, d)

    gen = _tpu_generation()
    cfg = _GEN_CFG[gen]
    budget = cfg["budget"]
    want_two = (gen == "v7x")   # shard token tiles over the 2 TensorCores

    # Strategy: keep weights VMEM-resident if double-buffered bf16 W1/W2 plus
    # a useful (>=256-token or full-M) tile fit the per-core budget.
    w_bytes_res = 8 * d * hid               # 2 weights * bf16 * 2 buffers
    per_tok_res = 28 * d + 8 * hid          # x/out blocks, LN temps, h, xn
    resident = (w_bytes_res + per_tok_res * min(256, m) + (1 << 20)) <= budget

    if resident:
        tm_max = max(8, (budget - w_bytes_res) // per_tok_res)
        tm = _pick_tm(m, cfg["tm_target"], tm_max, want_two)
        out = _ffn_resident(x2d, params, tm, cfg["vmem_limit"])
    else:
        th = _pick_tile(hid, cfg["th_cands"])
        fixed_t = 8 * d * th + (1 << 20)    # double-buffered weight tiles
        per_tok_t = 26 * d + 6 * th
        tm_max = max(8, (budget - fixed_t) // per_tok_t)
        tm = _pick_tm(m, cfg["tm_target"], tm_max, want_two)
        out = _ffn_tiled(x2d, params, tm, th, cfg["vmem_limit"])

    return out.reshape(batch, seq, d)


# ------------------------------- reference ----------------------------------

def reference(x, gamma, beta, w1, b1, w2, b2):
    """Pure-JAX f32 reference mirroring the PyTorch forward (eval mode)."""
    mean = jnp.mean(x, axis=-1, keepdims=True)
    var = jnp.mean((x - mean) ** 2, axis=-1, keepdims=True)
    xn = (x - mean) / jnp.sqrt(var + _EPS) * gamma + beta
    h = xn @ w1 + b1
    h = 0.5 * h * (1.0 + jnp.tanh(_GELU_C * (h + 0.044715 * h ** 3)))
    return h @ w2 + b2


def _make_params(key, d_model, hidden):
    k1, k2, k3, k4 = jax.random.split(key, 4)
    lim1 = 1.0 / math.sqrt(d_model)
    lim2 = 1.0 / math.sqrt(hidden)
    w1 = jax.random.uniform(k1, (d_model, hidden), jnp.float32, -lim1, lim1)
    b1 = jax.random.uniform(k2, (hidden,), jnp.float32, -lim1, lim1)
    w2 = jax.random.uniform(k3, (hidden, d_model), jnp.float32, -lim2, lim2)
    b2 = jax.random.uniform(k4, (d_model,), jnp.float32, -lim2, lim2)
    gamma = jnp.ones((d_model,), jnp.float32)
    beta = jnp.zeros((d_model,), jnp.float32)
    return gamma, beta, w1, b1, w2, b2


if __name__ == "__main__":
    key = jax.random.PRNGKey(0)
    k_a, k_b, k_pa, k_pb = jax.random.split(key, 4)

    # --- test 1: small module shapes (d_model=32) -> resident-weights path ---
    batch, seq, d_model = 2, 8, 32
    hidden = d_model * 2
    x = jax.random.normal(k_a, (batch, seq, d_model), dtype=jnp.float32)
    gamma, beta, w1, b1, w2, b2 = _make_params(k_pa, d_model, hidden)
    params = prepare_ffn_params(gamma, beta, w1, b1, w2, b2)

    y = jax.block_until_ready(feed_forward(x, params))
    y_ref = reference(x, gamma, beta, w1, b1, w2, b2)
    assert y.shape == (batch, seq, d_model)
    # bf16 MXU matmuls (f32 accumulation) -> loosened tolerance vs f32 reference.
    assert jnp.allclose(y, y_ref, atol=5e-2, rtol=5e-2), "resident path mismatch"

    # --- test 2: exercise the streamed/tiled path (hidden split over j) ---
    d2, hid2 = 128, 256
    x2 = jax.random.normal(k_b, (batch, seq, d2), dtype=jnp.float32)
    g2, be2, w1_2, b1_2, w2_2, b2_2 = _make_params(k_pb, d2, hid2)
    params2 = prepare_ffn_params(g2, be2, w1_2, b1_2, w2_2, b2_2)
    y2 = _ffn_tiled(x2.reshape(batch * seq, d2), params2, tm=16, th=128,
                    vmem_limit=48 << 20).reshape(batch, seq, d2)
    y2 = jax.block_until_ready(y2)
    y2_ref = reference(x2, g2, be2, w1_2, b1_2, w2_2, b2_2)
    assert jnp.allclose(y2, y2_ref, atol=5e-2, rtol=5e-2), "tiled path mismatch"

    print("KERNEL_OK")
</pallas_src>

<mosaic_0001>
module attributes {stable_mosaic.version = 11 : i64} {
  func.func @ffn_kernel_resident(%arg0: i32, %arg1: memref<16x32xf32, #tpu.memory_space<vmem>>, %arg2: memref<1x32xf32, #tpu.memory_space<vmem>>, %arg3: memref<1x32xf32, #tpu.memory_space<vmem>>, %arg4: memref<32x64xbf16, #tpu.memory_space<vmem>>, %arg5: memref<1x64xf32, #tpu.memory_space<vmem>>, %arg6: memref<64x32xbf16, #tpu.memory_space<vmem>>, %arg7: memref<1x32xf32, #tpu.memory_space<vmem>>, %arg8: memref<16x32xf32, #tpu.memory_space<vmem>>) attributes {dimension_semantics = [#tpu.dimension_semantics<parallel>], iteration_bounds = array<i64: 1>, scalar_prefetch = 0 : i64, scratch_operands = 0 : i64, tpu.core_type = #tpu.core_type<tc>, window_params = [{transform_indices = @transform_0, window_bounds = array<i64: 16, 32>}, {pipeline_mode = #tpu.pipeline_mode<synchronous>, transform_indices = @transform_1, window_bounds = array<i64: 1, 32>}, {pipeline_mode = #tpu.pipeline_mode<synchronous>, transform_indices = @transform_2, window_bounds = array<i64: 1, 32>}, {pipeline_mode = #tpu.pipeline_mode<synchronous>, transform_indices = @transform_3, window_bounds = array<i64: 32, 64>}, {pipeline_mode = #tpu.pipeline_mode<synchronous>, transform_indices = @transform_4, window_bounds = array<i64: 1, 64>}, {pipeline_mode = #tpu.pipeline_mode<synchronous>, transform_indices = @transform_5, window_bounds = array<i64: 64, 32>}, {pipeline_mode = #tpu.pipeline_mode<synchronous>, transform_indices = @transform_6, window_bounds = array<i64: 1, 32>}, {transform_indices = @transform_7, window_bounds = array<i64: 16, 32>}]} {
    %c0 = arith.constant 0 : index
    %c0_0 = arith.constant 0 : index
    %0 = vector.load %arg1[%c0, %c0_0] : memref<16x32xf32, #tpu.memory_space<vmem>>, vector<16x32xf32>
    %c0_1 = arith.constant 0 : index
    %c0_2 = arith.constant 0 : index
    %1 = vector.load %arg2[%c0_1, %c0_2] : memref<1x32xf32, #tpu.memory_space<vmem>>, vector<1x32xf32>
    %c0_3 = arith.constant 0 : index
    %c0_4 = arith.constant 0 : index
    %2 = vector.load %arg3[%c0_3, %c0_4] : memref<1x32xf32, #tpu.memory_space<vmem>>, vector<1x32xf32>
    %cst = arith.constant dense<0.000000e+00> : vector<16xf32>
    %3 = vector.multi_reduction <add>, %0, %cst [1] : vector<16x32xf32> to vector<16xf32>
    %4 = vector.shape_cast %3 : vector<16xf32> to vector<16x1xf32>
    %cst_5 = arith.constant 3.200000e+01 : f32
    %5 = vector.broadcast %cst_5 : f32 to vector<16x1xf32>
    %6 = arith.divf %4, %5 : vector<16x1xf32>
    %7 = vector.broadcast %6 : vector<16x1xf32> to vector<16x32xf32>
    %8 = arith.subf %0, %7 : vector<16x32xf32>
    %9 = arith.mulf %8, %8 : vector<16x32xf32>
    %cst_6 = arith.constant dense<0.000000e+00> : vector<16xf32>
    %10 = vector.multi_reduction <add>, %9, %cst_6 [1] : vector<16x32xf32> to vector<16xf32>
    %11 = vector.shape_cast %10 : vector<16xf32> to vector<16x1xf32>
    %cst_7 = arith.constant 3.200000e+01 : f32
    %12 = vector.broadcast %cst_7 : f32 to vector<16x1xf32>
    %13 = arith.divf %11, %12 : vector<16x1xf32>
    %cst_8 = arith.constant 9.99999997E-7 : f32
    %14 = vector.broadcast %cst_8 : f32 to vector<16x1xf32>
    %15 = arith.addf %13, %14 : vector<16x1xf32>
    %16 = math.rsqrt %15 : vector<16x1xf32>
    %17 = vector.broadcast %16 : vector<16x1xf32> to vector<16x32xf32>
    %18 = arith.mulf %8, %17 : vector<16x32xf32>
    %19 = vector.broadcast %1 : vector<1x32xf32> to vector<16x32xf32>
    %20 = arith.mulf %18, %19 : vector<16x32xf32>
    %21 = vector.broadcast %2 : vector<1x32xf32> to vector<16x32xf32>
    %22 = arith.addf %20, %21 : vector<16x32xf32>
    %23 = arith.truncf %22 : vector<16x32xf32> to vector<16x32xbf16>
    %c0_9 = arith.constant 0 : index
    %c0_10 = arith.constant 0 : index
    %24 = vector.load %arg4[%c0_9, %c0_10] : memref<32x64xbf16, #tpu.memory_space<vmem>>, vector<32x64xbf16>
    %cst_11 = arith.constant dense<0.000000e+00> : vector<16x64xf32>
    %25 = tpu.matmul %23, %24, %cst_11 {dimension_numbers = #tpu.dot_dimension_numbers<[1], [0], [0], [1], [0, 0, 1, 1], [], []>} : vector<16x32xbf16>, vector<32x64xbf16>, vector<16x64xf32> -> vector<16x64xf32>
    %c0_12 = arith.constant 0 : index
    %c0_13 = arith.constant 0 : index
    %26 = vector.load %arg5[%c0_12, %c0_13] : memref<1x64xf32, #tpu.memory_space<vmem>>, vector<1x64xf32>
    %27 = vector.broadcast %26 : vector<1x64xf32> to vector<16x64xf32>
    %28 = arith.addf %25, %27 : vector<16x64xf32>
    %cst_14 = arith.constant 5.000000e-01 : f32
    %29 = vector.broadcast %cst_14 : f32 to vector<16x64xf32>
    %30 = arith.mulf %29, %28 : vector<16x64xf32>
    %cst_15 = arith.constant 0.797884583 : f32
    %31 = vector.broadcast %cst_15 : f32 to vector<16x64xf32>
    %32 = arith.mulf %31, %28 : vector<16x64xf32>
    %cst_16 = arith.constant 4.471500e-02 : f32
    %33 = vector.broadcast %cst_16 : f32 to vector<16x64xf32>
    %34 = arith.mulf %33, %28 : vector<16x64xf32>
    %35 = arith.mulf %34, %28 : vector<16x64xf32>
    %cst_17 = arith.constant 1.000000e+00 : f32
    %36 = vector.broadcast %cst_17 : f32 to vector<16x64xf32>
    %37 = arith.addf %36, %35 : vector<16x64xf32>
    %38 = arith.mulf %32, %37 : vector<16x64xf32>
    %39 = math.tanh %38 : vector<16x64xf32>
    %cst_18 = arith.constant 1.000000e+00 : f32
    %40 = vector.broadcast %cst_18 : f32 to vector<16x64xf32>
    %41 = arith.addf %40, %39 : vector<16x64xf32>
    %42 = arith.mulf %30, %41 : vector<16x64xf32>
    %43 = arith.truncf %42 : vector<16x64xf32> to vector<16x64xbf16>
    %c0_19 = arith.constant 0 : index
    %c0_20 = arith.constant 0 : index
    %44 = vector.load %arg6[%c0_19, %c0_20] : memref<64x32xbf16, #tpu.memory_space<vmem>>, vector<64x32xbf16>
    %cst_21 = arith.constant dense<0.000000e+00> : vector<16x32xf32>
    %45 = tpu.matmul %43, %44, %cst_21 {dimension_numbers = #tpu.dot_dimension_numbers<[1], [0], [0], [1], [0, 0, 1, 1], [], []>} : vector<16x64xbf16>, vector<64x32xbf16>, vector<16x32xf32> -> vector<16x32xf32>
    %c0_22 = arith.constant 0 : index
    %c0_23 = arith.constant 0 : index
    %46 = vector.load %arg7[%c0_22, %c0_23] : memref<1x32xf32, #tpu.memory_space<vmem>>, vector<1x32xf32>
    %47 = vector.broadcast %46 : vector<1x32xf32> to vector<16x32xf32>
    %48 = arith.addf %45, %47 : vector<16x32xf32>
    %c0_24 = arith.constant 0 : index
    %c0_25 = arith.constant 0 : index
    %49 = vector.load %arg8[%c0_24, %c0_25] : memref<16x32xf32, #tpu.memory_space<vmem>>, vector<16x32xf32>
    tpu.vector_store %arg8[%c0_24, %c0_25], %48 {strides = array<i32>} : memref<16x32xf32, #tpu.memory_space<vmem>>, vector<16x32xf32>,
    return
  }
  func.func @transform_0(%arg0: i32) -> (i32, i32) {
    %c0_i32 = arith.constant 0 : i32
    %c0_i32_0 = arith.constant 0 : i32
    return %arg0, %c0_i32 : i32, i32
  }
  func.func @transform_1(%arg0: i32) -> (i32, i32) {
    %c0_i32 = arith.constant 0 : i32
    %c0_i32_0 = arith.constant 0 : i32
    %c0_i32_1 = arith.constant 0 : i32
    return %c0_i32, %c0_i32_0 : i32, i32
  }
  func.func @transform_2(%arg0: i32) -> (i32, i32) {
    %c0_i32 = arith.constant 0 : i32
    %c0_i32_0 = arith.constant 0 : i32
    %c0_i32_1 = arith.constant 0 : i32
    return %c0_i32, %c0_i32_0 : i32, i32
  }
  func.func @transform_3(%arg0: i32) -> (i32, i32) {
    %c0_i32 = arith.constant 0 : i32
    %c0_i32_0 = arith.constant 0 : i32
    %c0_i32_1 = arith.constant 0 : i32
    return %c0_i32, %c0_i32_0 : i32, i32
  }
  func.func @transform_4(%arg0: i32) -> (i32, i32) {
    %c0_i32 = arith.constant 0 : i32
    %c0_i32_0 = arith.constant 0 : i32
    %c0_i32_1 = arith.constant 0 : i32
    return %c0_i32, %c0_i32_0 : i32, i32
  }
  func.func @transform_5(%arg0: i32) -> (i32, i32) {
    %c0_i32 = arith.constant 0 : i32
    %c0_i32_0 = arith.constant 0 : i32
    %c0_i32_1 = arith.constant 0 : i32
    return %c0_i32, %c0_i32_0 : i32, i32
  }
  func.func @transform_6(%arg0: i32) -> (i32, i32) {
    %c0_i32 = arith.constant 0 : i32
    %c0_i32_0 = arith.constant 0 : i32
    %c0_i32_1 = arith.constant 0 : i32
    return %c0_i32, %c0_i32_0 : i32, i32
  }
  func.func @transform_7(%arg0: i32) -> (i32, i32) {
    %c0_i32 = arith.constant 0 : i32
    %c0_i32_0 = arith.constant 0 : i32
    return %arg0, %c0_i32 : i32, i32
  }
}

</mosaic_0001>

<bundles_post_ra>
// kernel: tpu_custom_call.1
= control target key start
LH: loop header
LB: loop body
LE: loop exit
PB: predicated region body
PF: predicated region fallthrough
CT: control target
= control target key end

     0   :  { %vm32_vm0 = vcmask 261120   ;;  %s437_s0 = inlined_call_operand.vmem [shape: f32[16,32], index: 0, kind: input, shape index: {}]   ;;  %s438_s1 = inlined_call_operand.vmem [shape: f32[1,32], index: 1, kind: input, shape index: {}]   ;;  %s439_s2 = inlined_call_operand.vmem [shape: f32[1,32], index: 2, kind: input, shape index: {}]   ;;  %s440_s3 = inlined_call_operand.vmem [shape: bf16[32,64], index: 3, kind: input, shape index: {}]   ;;  %s441_s4 = inlined_call_operand.vmem [shape: f32[1,64], index: 4, kind: input, shape index: {}]   ;;  %s442_s5 = inlined_call_operand.vmem [shape: bf16[64,32], index: 5, kind: input, shape index: {}]   ;;  %s443_s6 = inlined_call_operand.vmem [shape: f32[1,32], index: 6, kind: input, shape index: {}]   ;;  %s444_s7 = inlined_call_operand.hbm [shape: f32[16,32], index: 7, kind: output, shape index: {}]  }
   0x1   :  { %v28_v0 = vld [vmem:[%s437_s0] sm:$0xff]  ;;  %v29_v1 = vld [vmem:[%s437_s0 + $0x8] sm:$0xff] }
   0x2   :  { %v33_v2 = vsel %vm32_vm0, %v28_v0, 0.0  ;;  %v36_v3 = vsel %vm32_vm0, %v29_v1, 0.0 }
   0x3   :  { %34 = vadd.xlane.f32.xlu0 %v33_v2 }
   0x4   :  { %12 = vsyncpa [#allocation3], 0  ;;  %v310_v14 = vld [vmem:[%s440_s3 + $0x8] sm:$0xff]   ;;  %v346_v15 = vmov 0.0   ;;  %vm347_vm1 = vmmov 0   ;;  %v311_v16 = vld [vmem:[%s440_s3] sm:$0xff]  }
   0x5   :  { %285 = vmatprep.subr.bf16.mxu0 %v346_v15  ;;  %289 = vmatprep.mubr.msk.bf16.mxu0 %vm347_vm1, %v346_v15  ;;  %v265_v25 = vld [vmem:[%s438_s1] ss:$0 sm:$0xff]  ;;  %v312_v34 = vld [vmem:[%s442_s5 + $0x18] sm:$0xff]   ;;  %v313_v35 = vld [vmem:[%s442_s5 + $0x10] sm:$0xff]   ;;  %vm202_vm2 = vcmask 523264   ;;  %s348_s19 = smov [#allocation2]  }
   0x6   :  { %286 = vmatpush3.bf16.msra.mxu0 %v310_v14  ;;  %293 = vmatprep.subr.bf16.mxu1 %v346_v15  ;;  %v266_v29 = vld [vmem:[%s439_s2] ss:$0 sm:$0xff]  ;;  %v314_v36 = vld [vmem:[%s442_s5 + $0x8] sm:$0xff]   ;;  %s254_s20 = sshll.u32 %s348_s19, 4  ;;  %s255_s20 = int_to_ptr.vmem [resolvable:$true] %s254_s20 }
   0x7   :  { %37 = vadd.xlane.f32.xlu0 %v36_v3  ;;  %287 = vmatprep.subr.bf16.mxu0 %v346_v15  ;;  %v315_v37 = vld [vmem:[%s442_s5] sm:$0xff]   ;;  %s324_s21 = scalar_lea.vmem %s255_s20, 256  ;;  %p329_p1 = scmp.lt.s32.totalorder %s255_s20, %s255_s20 }
   0x8   :  { %301 = vmatprep.mubr.msk.bf16.mxu1 %vm347_vm1, %v346_v15  ;;  %294 = vmatpush3.bf16.msra.mxu1 %v312_v34  ;;  %v267_v38 = vld [vmem:[%s441_s4] ss:$0 sm:$0xff]  ;;  %p325_p0 = scmp.ne.s32.totalorder %s255_s20, %s324_s21  ;;  %p330_p2 = scmp.lt.s32.totalorder %s324_s21, %s324_s21 }
   0x9   :  { %295 = vmatprep.subr.bf16.mxu1 %v346_v15 }
   0xa   :  { %288 = vmatpush3.bf16.msra.mxu0 %v311_v16  ;;  %p331_p3 = por %p330_p2, %p329_p1 }
   0xc   :  { %296 = vmatpush3.bf16.msra.mxu1 %v313_v35  ;;  %p332_p4 = pnand %p331_p3, %p325_p0 }
   0xd   :  { %297 = vmatprep.subr.bf16.mxu1 %v346_v15 }
  0x10   :  { %298 = vmatpush3.bf16.msra.mxu1 %v314_v36 }
  0x11   :  { %299 = vmatprep.subr.bf16.mxu1 %v346_v15 }
  0x14   :  { %300 = vmatpush3.bf16.msra.mxu1 %v315_v37 }
  0x8c   :  { %v35_v4 = vpop.xlane.xlu0 %34 }
  0x8d   :  { %v40_v5 = vmul.f32 0.03125, %v35_v4 }
  0x8f   :  { %v42_v6 = vsub.f32 %v28_v0, %v40_v5  ;;  %v271_v0 = vld [vmem:[%s443_s6] ss:$0 sm:$0xff] }
  0x90   :  { %v38_v7 = vpop.xlane.xlu0 %37 }
  0x91   :  { %v41_v8 = vmul.f32 0.03125, %v38_v7  ;;  %v44_v9 = vmul.f32 %v42_v6, %v42_v6 }
  0x93   :  { %v43_v10 = vsub.f32 %v29_v1, %v41_v8  ;;  %v46_v11 = vsel %vm32_vm0, %v44_v9, 0.0 }
  0x94   :  { %47 = vadd.xlane.f32.xlu1 %v46_v11 }
  0x95   :  { %v45_v12 = vmul.f32 %v43_v10, %v43_v10 }
  0x97   :  { %v49_v13 = vsel %vm32_vm0, %v45_v12, 0.0 }
  0x98   :  { %50 = vadd.xlane.f32.xlu1 %v49_v13 }
 0x11d   :  { %v48_v17 = vpop.xlane.xlu1 %47 }
 0x11e   :  { %v52_v18 = vmul.f32 0.03125, %v48_v17 }
 0x120   :  { %v54_v19 = vadd.f32 1e-06, %v52_v18 }
 0x121   :  { %v51_v20 = vpop.xlane.xlu1 %50 }
 0x122   :  { %316 = vrsqrt.f32 %v54_v19  ;;  %v53_v21 = vmul.f32 0.03125, %v51_v20 }
 0x124   :  { %v55_v22 = vadd.f32 1e-06, %v53_v21 }
 0x126   :  { %318 = vrsqrt.f32 %v55_v22 }
 0x12f   :  { %v317_v23 = vpop.eup %316 }
 0x130   :  { %v58_v24 = vmul.f32 %v317_v23, %v42_v6 }
 0x132   :  { %v66_v28 = vmul.f32 %v265_v25, %v58_v24 }
 0x133   :  { %v319_v26 = vpop.eup %318 }
 0x134   :  { %v59_v27 = vmul.f32 %v319_v26, %v43_v10  ;;  %v74_v31 = vadd.f32 %v266_v29, %v66_v28 }
 0x136   :  { %v67_v30 = vmul.f32 %v265_v25, %v59_v27 }
 0x138   :  { %v75_v32 = vadd.f32 %v266_v29, %v67_v30 }
 0x13a   :  { %v76_v33 = vpack.c.bf16 %v75_v32, %v74_v31 }
 0x13c   :  { %290 = vmatmul.mubr.msk.bf16.vlgmr.msra.gmra.mxu0 %vm32_vm0, %v76_v33 }
 0x1fc   :  { %v137_v39 = vpop.f32.mrf.mxu0 }
 0x1fd   :  { %v138_v40 = vadd.f32 %v267_v38, %v137_v39 }
 0x1fe   :  { %v291_v41 = vpop.f32.mrf.mxu0 }
 0x1ff   :  { %v148_v42 = vmul.f32 0.044715, %v138_v40  ;;  %v146_v47 = vmul.f32 0.7978846, %v138_v40  ;;  %v144_v58 = vmul.f32 0.5, %v138_v40 }
 0x200   :  { %v140_v43 = vpop.f32.mrf.mxu0 }
 0x201   :  { %v150_v44 = vmul.f32 %v148_v42, %v138_v40  ;;  %v141_v45 = vadd.f32 %v267_v38, %v140_v43 }
 0x202   :  { %v292_v46 = vpop.f32.mrf.mxu0 }
 0x203   :  { %v152_v48 = vadd.f32 1.0, %v150_v44  ;;  %v149_v49 = vmul.f32 0.044715, %v141_v45  ;;  %v147_v52 = vmul.f32 0.7978846, %v141_v45  ;;  %v145_v59 = vmul.f32 0.5, %v141_v45 }
 0x205   :  { %v154_v50 = vmul.f32 %v152_v48, %v146_v47  ;;  %v151_v51 = vmul.f32 %v149_v49, %v141_v45 }
 0x207   :  { %320 = vtanh.f32 %v154_v50  ;;  %v153_v53 = vadd.f32 1.0, %v151_v51 }
 0x209   :  { %v155_v54 = vmul.f32 %v153_v53, %v147_v52 }
 0x20b   :  { %322 = vtanh.f32 %v155_v54 }
 0x214   :  { %v321_v55 = vpop.eup %320 }
 0x215   :  { %v158_v56 = vadd.f32 1.0, %v321_v55 }
 0x217   :  { %v160_v61 = vmul.f32 %v158_v56, %v144_v58 }
 0x218   :  { %v323_v57 = vpop.eup %322 }
 0x219   :  { %v159_v60 = vadd.f32 1.0, %v323_v57 }
 0x21b   :  { %v161_v62 = vmul.f32 %v159_v60, %v145_v59 }
 0x21d   :  { %v162_v63 = vpack.c.bf16 %v161_v62, %v160_v61 }
 0x21f   :  { %302 = vmatmul.mubr.msk.bf16.vlgmr.msra.gmra.mxu1 %vm202_vm2, %v162_v63 }
 0x2df   :  { %v240_v1 = vpop.f32.mrf.mxu1 }
 0x2e0   :  { %v241_v2 = vadd.f32 %v271_v0, %v240_v1 }
 0x2e1   :  { %v303_v3 = vpop.f32.mrf.mxu1 }
 0x2e2   :  { %247 = vst.msk [vmem:[#allocation2] sm:$0xff] %vm32_vm0, %v241_v2 }
 0x2e3   :  { %v243_v4 = vpop.f32.mrf.mxu1 }
 0x2e4   :  { %v244_v5 = vadd.f32 %v271_v0, %v243_v4 }
 0x2e5   :  { %v304_v6 = vpop.f32.mrf.mxu1 }
 0x2e6   :  { %248 = vst.msk [vmem:[#allocation2 + $0x8] sm:$0xff] %vm32_vm0, %v244_v5 }
 0x2e7   :  { %335 = shalt.err (!%p332_p4)
}
 0x2e8   :  { %s349_s6 = smov 128   ;;  %s350_s22 = smov 8  }
 0x2e9   :  { %260 = dma.vmem_to_hbm [thread:$0]  %s255_s20, 256, %s444_s7, [#allocation3], %s349_s6, %s349_s6, %s350_s22  }
 0x2ea   :  { %344 = dma.done.wait [#allocation3], 256  }
 0x2eb   :  { %345 = vsyncadd [#allocation3], 4294967040 }
 0x2ec   :  { %264 = vsyncpa [#allocation3], 1 }

</bundles_post_ra>
